<compile_context>
chip_gen: v5e
topology: v5e:2x2
jax: 0.10.0
libtpu: 0.0.40
codegen_flags: <defaults>
</compile_context>

<pallas_src>
import math

import jax
import jax.numpy as jnp
from jax.experimental import pallas as pl
from jax.experimental.pallas import tpu as pltpu


# --------------------------------------------------------------------------- #
# Positional-encoding table (identical to the PyTorch __init__ buffer).
# --------------------------------------------------------------------------- #
def _build_pe_flat(d_model: int, max_len: int = 5000, dtype=jnp.float32) -> jnp.ndarray:
    """Sinusoidal table, built once, returned flattened as (1, max_len * d_model)."""
    assert d_model % 2 == 0, "d_model must be even (same constraint as the PyTorch module)"
    position = jnp.arange(max_len, dtype=jnp.float32)[:, None]                 # (max_len, 1)
    div_term = jnp.exp(
        jnp.arange(0, d_model, 2, dtype=jnp.float32) * (-math.log(10000.0) / d_model)
    )                                                                           # (d_model//2,)
    pe = jnp.zeros((max_len, d_model), dtype=jnp.float32)
    pe = pe.at[:, 0::2].set(jnp.sin(position * div_term))
    pe = pe.at[:, 1::2].set(jnp.cos(position * div_term))
    # Row-major flatten: columns [0, S*d_model) of this are exactly pe[:S] flattened.
    return pe.reshape(1, max_len * d_model).astype(dtype)


# --------------------------------------------------------------------------- #
# Small helpers.
# --------------------------------------------------------------------------- #
def _round_up(a: int, m: int) -> int:
    return ((a + m - 1) // m) * m


def _sublanes(dtype) -> int:
    """Sublanes per vreg row-group for this dtype: 8 (f32), 16 (bf16), 32 (int8)."""
    return max(8, 32 // jnp.dtype(dtype).itemsize)


def _choose_col_tile(cols: int, padded_rows: int, itemsize: int, *,
                     vmem_budget_bytes: int = 8 << 20, min_tiles: int = 1) -> int:
    """Pick a lane-dense (multiple-of-128) column tile <= cols (requires cols >= 128).

    padded_rows = total sublane-padded VMEM rows of all column-scaling blocks
    (x block + out block + pe block).  x2 accounts for the pipeline's double
    buffering of every block.  Tiles are balanced across the grid so the trailing
    tile is never a tiny ragged sliver.
    """
    per_col_bytes = padded_rows * itemsize * 2              # x2: double-buffered pipeline
    target = max(128, (vmem_budget_bytes // per_col_bytes) // 128 * 128)
    max_tc = (cols // 128) * 128                            # largest 128-multiple <= cols
    target = min(target, max_tc)
    n_tiles = max(min_tiles, pl.cdiv(cols, target))
    tc = min(max_tc, _round_up(pl.cdiv(cols, n_tiles), 128))
    return tc


# --------------------------------------------------------------------------- #
# Kernels.
# --------------------------------------------------------------------------- #
def _add_pe_broadcast_kernel(x_ref, pe_ref, o_ref):
    # x_ref: (B, tc), pe_ref: (1, tc) -> broadcast add over the batch rows.
    o_ref[...] = x_ref[...] + pe_ref[...]


def _add_pe_dense_kernel(x_ref, pe_ref, o_ref):
    # x_ref: (B*sub, tc), pe_ref: (sub, tc).  Rows b*sub..(b+1)*sub of x need pe.
    sub = pe_ref.shape[0]
    b = x_ref.shape[0] // sub
    pe = pe_ref[...]
    for i in range(b):                                   # b < sub: tiny static unroll
        o_ref[i * sub:(i + 1) * sub, :] = x_ref[i * sub:(i + 1) * sub, :] + pe


# --------------------------------------------------------------------------- #
# pallas_call wrappers.
# --------------------------------------------------------------------------- #
def _add_pe_broadcast(x2, pe_flat, donate_x):
    """x2: (B, cols); pe_flat: (1, >= cols)."""
    B, cols = x2.shape
    itemsize = jnp.dtype(x2.dtype).itemsize
    sub = _sublanes(x2.dtype)

    if cols < 128:
        # Tiny corner case: no 128-multiple tile possible; slice pe so every block
        # equals its full array dims (always legal).  Copy is a few hundred bytes.
        pe_op = pe_flat[:, :cols]
        tc = cols
    else:
        pe_op = pe_flat                                   # full table, no per-call slice
        padded_rows = 2 * _round_up(B, sub) + sub         # x + out + pe, sublane padded
        min_tiles = 2 if x2.size * itemsize >= (1 << 20) else 1   # keep both v7x TCs busy
        tc = _choose_col_tile(cols, padded_rows, itemsize, min_tiles=min_tiles)

    grid = (pl.cdiv(cols, tc),)
    return pl.pallas_call(
        _add_pe_broadcast_kernel,
        out_shape=jax.ShapeDtypeStruct((B, cols), x2.dtype),
        grid=grid,
        in_specs=[
            pl.BlockSpec((B, tc), lambda c: (0, c)),      # all batch rows, one column tile
            pl.BlockSpec((1, tc), lambda c: (0, c)),      # same column window of pe table
        ],
        out_specs=pl.BlockSpec((B, tc), lambda c: (0, c)),
        compiler_params=pltpu.CompilerParams(dimension_semantics=("parallel",)),
        input_output_aliases={0: 0} if donate_x else {},
    )(x2, pe_op)


def _add_pe_dense(x2, pe_dense, donate_x):
    """x2: (B*sub, inner); pe_dense: (sub, inner).  Sublane-dense, row-aligned add."""
    rows, inner = x2.shape
    sub = pe_dense.shape[0]
    itemsize = jnp.dtype(x2.dtype).itemsize
    padded_rows = 2 * rows + sub                          # already sublane-aligned
    min_tiles = 2 if x2.size * itemsize >= (1 << 20) else 1
    tc = _choose_col_tile(inner, padded_rows, itemsize, min_tiles=min_tiles)

    grid = (pl.cdiv(inner, tc),)
    return pl.pallas_call(
        _add_pe_dense_kernel,
        out_shape=jax.ShapeDtypeStruct((rows, inner), x2.dtype),
        grid=grid,
        in_specs=[
            pl.BlockSpec((rows, tc), lambda c: (0, c)),
            pl.BlockSpec((sub, tc), lambda c: (0, c)),
        ],
        out_specs=pl.BlockSpec((rows, tc), lambda c: (0, c)),
        compiler_params=pltpu.CompilerParams(dimension_semantics=("parallel",)),
        input_output_aliases={0: 0} if donate_x else {},
    )(x2, pe_dense)


# --------------------------------------------------------------------------- #
# Module-like wrapper (mirrors the PyTorch nn.Module: table built once in __init__).
# --------------------------------------------------------------------------- #
class PositionalEncoding:
    def __init__(self, d_model: int, max_len: int = 5000, dtype=jnp.float32):
        if d_model % 2 != 0:
            raise ValueError("d_model must be even")
        self.d_model = d_model
        self.max_len = max_len
        self.dtype = jnp.dtype(dtype)
        self.pe_flat = _build_pe_flat(d_model, max_len, self.dtype)   # (1, max_len*d_model)
        self._dense_pe_cache = {}                                     # (S, dtype) -> dense view

    def __call__(self, x: jnp.ndarray, *, donate_x: bool = False) -> jnp.ndarray:
        B, S, D = x.shape
        if S > self.max_len:
            raise ValueError(f"sequence length {S} exceeds max_len {self.max_len}")
        if D != self.d_model:
            raise ValueError(f"d_model mismatch: x has {D}, module has {self.d_model}")
        pe_flat = self.pe_flat if x.dtype == self.dtype else self.pe_flat.astype(x.dtype)

        cols = S * D
        sub = _sublanes(x.dtype)
        if B < sub and cols % (sub * 128) == 0:
            # Small batch: sublane-dense layout (B*sub rows, cols/sub lane-dense cols).
            key = (S, str(jnp.dtype(x.dtype)))
            pe_dense = self._dense_pe_cache.get(key)
            if pe_dense is None:                          # materialized once per (S, dtype)
                pe_dense = pe_flat[:, :cols].reshape(sub, cols // sub)
                self._dense_pe_cache[key] = pe_dense
            out2 = _add_pe_dense(x.reshape(B * sub, cols // sub), pe_dense, donate_x)
        else:
            out2 = _add_pe_broadcast(x.reshape(B, cols), pe_flat, donate_x)
        return out2.reshape(B, S, D)


# --------------------------------------------------------------------------- #
# Self-test.
# --------------------------------------------------------------------------- #
if __name__ == "__main__":
    d_model, max_len = 32, 5000
    posenc = PositionalEncoding(d_model, max_len=max_len, dtype=jnp.float32)
    pe3d = posenc.pe_flat.reshape(1, max_len, d_model)    # reference view of the buffer

    # (B, S, D) cases covering: single-tile broadcast, multi-tile balanced + partial
    # tail, sublane-dense small-batch path, cols<128 fallback, and B == sublanes.
    cases = [(2, 8, 32), (2, 41, 32), (2, 32, 32), (2, 3, 32), (8, 16, 32)]

    key = jax.random.PRNGKey(0)
    for (B, S, D) in cases:
        key, sk = jax.random.split(key)
        x = jax.random.normal(sk, (B, S, D), dtype=jnp.float32)
        out = jax.block_until_ready(posenc(x))
        ref = x + pe3d[:, :S, :]
        assert out.shape == (B, S, D)
        assert jnp.allclose(out, ref, atol=1e-6), f"mismatch vs reference for {(B, S, D)}"

    print("KERNEL_OK")
</pallas_src>

<mosaic_0001>
module attributes {stable_mosaic.version = 11 : i64} {
  func.func @_add_pe_broadcast_kernel(%arg0: i32, %arg1: memref<2x256xf32, #tpu.memory_space<vmem>>, %arg2: memref<1x256xf32, #tpu.memory_space<vmem>>, %arg3: memref<2x256xf32, #tpu.memory_space<vmem>>) attributes {dimension_semantics = [#tpu.dimension_semantics<parallel>], iteration_bounds = array<i64: 1>, scalar_prefetch = 0 : i64, scratch_operands = 0 : i64, tpu.core_type = #tpu.core_type<tc>, window_params = [{transform_indices = @transform_0, window_bounds = array<i64: 2, 256>}, {transform_indices = @transform_1, window_bounds = array<i64: 1, 256>}, {transform_indices = @transform_2, window_bounds = array<i64: 2, 256>}]} {
    %c0 = arith.constant 0 : index
    %c0_0 = arith.constant 0 : index
    %0 = vector.load %arg1[%c0, %c0_0] : memref<2x256xf32, #tpu.memory_space<vmem>>, vector<2x256xf32>
    %c0_1 = arith.constant 0 : index
    %c0_2 = arith.constant 0 : index
    %1 = vector.load %arg2[%c0_1, %c0_2] : memref<1x256xf32, #tpu.memory_space<vmem>>, vector<1x256xf32>
    %2 = vector.broadcast %1 : vector<1x256xf32> to vector<2x256xf32>
    %3 = arith.addf %0, %2 : vector<2x256xf32>
    %c0_3 = arith.constant 0 : index
    %c0_4 = arith.constant 0 : index
    %4 = vector.load %arg3[%c0_3, %c0_4] : memref<2x256xf32, #tpu.memory_space<vmem>>, vector<2x256xf32>
    tpu.vector_store %arg3[%c0_3, %c0_4], %3 {strides = array<i32>} : memref<2x256xf32, #tpu.memory_space<vmem>>, vector<2x256xf32>,
    return
  }
  func.func @transform_0(%arg0: i32) -> (i32, i32) {
    %c0_i32 = arith.constant 0 : i32
    %c0_i32_0 = arith.constant 0 : i32
    return %c0_i32, %arg0 : i32, i32
  }
  func.func @transform_1(%arg0: i32) -> (i32, i32) {
    %c0_i32 = arith.constant 0 : i32
    %c0_i32_0 = arith.constant 0 : i32
    return %c0_i32, %arg0 : i32, i32
  }
  func.func @transform_2(%arg0: i32) -> (i32, i32) {
    %c0_i32 = arith.constant 0 : i32
    %c0_i32_0 = arith.constant 0 : i32
    return %c0_i32, %arg0 : i32, i32
  }
}

</mosaic_0001>

<bundles_post_ra>
// kernel: tpu_custom_call.1
= control target key start
LH: loop header
LB: loop body
LE: loop exit
PB: predicated region body
PF: predicated region fallthrough
CT: control target
= control target key end

     0   :  { %7 = vsyncpa [#allocation3], 0  ;;  %s177_s0 = inlined_call_operand.hbm [shape: f32[2,256], index: 0, kind: input, shape index: {}]   ;;  %s178_s1 = inlined_call_operand.hbm [shape: f32[1,160000], index: 1, kind: input, shape index: {}]   ;;  %s179_s2 = inlined_call_operand.hbm [shape: f32[2,256], index: 2, kind: output, shape index: {}]  }
   0x1   :  { %8 = vsyncpa [#allocation6], 0 }
   0x2   :  { %9 = vsyncpa [#allocation4], 0  ;;  %s15_s11 = sshll.u32 %s177_s0, 4  ;;  %s150_s12 = smov [#allocation2]   ;;  %s16_s11 = int_to_ptr.hbm [resolvable:$true] %s15_s11 }
   0x3   :  { %s17_s13 = sshll.u32 %s150_s12, 4  ;;  %s26_s16 = sshll.u32 %s178_s1, 4  ;;  %s18_s13 = int_to_ptr.vmem [resolvable:$true] %s17_s13  ;;  %s27_s16 = int_to_ptr.hbm [resolvable:$true] %s26_s16 }
   0x4   :  { %20 = dma.hbm_to_vmem [thread:$0]  %s16_s11, 64, %s18_s13, [#allocation3]  }
   0x5   :  { %s151_s17 = smov [#allocation5]  }
   0x6   :  { %s28_s18 = sshll.u32 %s151_s17, 4  ;;  %s29_s18 = int_to_ptr.vmem [resolvable:$true] %s28_s18 }
   0x7   :  { %31 = dma.hbm_to_vmem [thread:$0]  %s27_s16, 32, %s29_s18, [#allocation6]  }
   0x8   :  { %144 = dma.done.wait [#allocation3], 64  }
   0x9   :  { %145 = vsyncadd [#allocation3], 4294967232 }
   0xa   :  { %146 = dma.done.wait [#allocation6], 32  }
   0xb   :  { %147 = vsyncadd [#allocation6], 4294967264  ;;  %v41_v0 = vld [vmem:[#allocation5] sm:$0x3]  ;;  %vm46_vm0 = vcmask 1041408   ;;  %s152_s0 = smov [#allocation7]  }
   0xc   :  { %v43_v1 = vperm.slane %v41_v0, 0  ;;  %v44_v2 = vperm.slane %v41_v0, 1  ;;  %v40_v3 = vld [vmem:[#allocation2] sm:$0xf]  ;;  %s56_s19 = sshll.u32 %s152_s0, 4  ;;  %s58_s21 = sshll.u32 %s179_s2, 4  ;;  %s57_s19 = int_to_ptr.vmem [resolvable:$true] %s56_s19  ;;  %s59_s21 = int_to_ptr.hbm [resolvable:$true] %s58_s21 }
   0xe   :  { %v45_v4 = vrot.slane %v44_v2, 6 }
  0x10   :  { %v47_v5 = vsel %vm46_vm0, %v43_v1, %v45_v4 }
  0x11   :  { %v49_v6 = vadd.f32 %v47_v5, %v40_v3 }
  0x13   :  { %50 = vst [vmem:[#allocation7] sm:$0xf] %v49_v6 }
  0x14   :  { %61 = dma.vmem_to_hbm [thread:$0]  %s57_s19, 64, %s59_s21, [#allocation4]  }
  0x15   :  { %148 = dma.done.wait [#allocation4], 64  }
  0x16   :  { %149 = vsyncadd [#allocation4], 4294967232 }
  0x17   :  { %66 = vsyncpa [#allocation3], 1 }
  0x18   :  { %67 = vsyncpa [#allocation6], 1 }
  0x19   :  { %68 = vsyncpa [#allocation4], 1 }

</bundles_post_ra>
